<compile_context>
chip_gen: v6e
topology: v6e:2x2x1
jax: 0.10.0
libtpu: 0.0.40
codegen_flags: <defaults>
</compile_context>

<pallas_src>
import functools

import jax
import jax.numpy as jnp
from jax.experimental import pallas as pl
from jax.experimental.pallas import tpu as pltpu


def _round_up(x, m):
    return ((x + m - 1) // m) * m


# ----------------------------- Pallas kernel --------------------------------
def _cond_double_q_kernel(x_ref, w1_ref, b1_ref, w2_ref, b2_ref, w3_ref, b3_ref,
                          out_ref, *, tanh_scale, both):
    """Fused double-Q MLP over one batch tile.

    x:  (BM, D)      W1: (D, 2H)    b1: (1, 2H)   [heads fused along N]
    W2: (2H, 2H) block-diagonal     b2: (1, 2H)
    W3: (2H, 2)  block-structured   b3: (1, 2)
    out: (BM, 2) if both else (BM, 1) = min(q1, q2)
    """
    x = x_ref[...]

    # Layer 1 (both heads in one MXU pass).
    h = jnp.dot(x, w1_ref[...], preferred_element_type=jnp.float32) + b1_ref[...]
    h = jnp.maximum(h, 0.0).astype(w2_ref.dtype)

    # Layer 2 (block-diagonal -> one MXU pass for both heads).
    h = jnp.dot(h, w2_ref[...], preferred_element_type=jnp.float32) + b2_ref[...]
    h = jnp.maximum(h, 0.0).astype(w3_ref.dtype)

    # Layer 3 (block-structured (2H, 2) -> (BM, 2) in one MXU pass).
    q = jnp.dot(h, w3_ref[...], preferred_element_type=jnp.float32) + b3_ref[...]

    if tanh_scale is not None:
        q = jnp.tanh(q) * tanh_scale

    if both:
        out_ref[...] = q.astype(out_ref.dtype)          # single dense store
    else:
        out_ref[...] = jnp.minimum(q[:, 0:1], q[:, 1:2]).astype(out_ref.dtype)


# ------------------------------ Wrapper --------------------------------------
def cond_double_q_forward(obs, action, cond, params, *, use_tanh, gamma,
                          both=False, block_m=8192,
                          compute_dtype=jnp.bfloat16):
    """Forward pass of CondDoubleQCritic via a single fused, batch-gridded kernel.

    obs:    [B, obs_dim]   action: [B, action_dim]   cond: [B, cond_dim] or None
    params: {"q1": {w1,b1,w2,b2,w3,b3}, "q2": {...}} with w1 [in_dim, H] laid out
            for the PyTorch concat order [obs, cond, action, cond].
    Returns min(q1, q2) [B,1], or (q1, q2) if both=True.
    """
    B = obs.shape[0]
    assert action.shape[0] == B
    has_cond = cond is not None and cond.shape[-1] > 0

    # Exact PyTorch concat order -> one input stream, no per-piece DMAs.
    pieces = [obs, cond, action, cond] if has_cond else [obs, action]
    x = jnp.concatenate(pieces, axis=-1).astype(compute_dtype)
    D = x.shape[-1]

    p1, p2 = params["q1"], params["q2"]
    H = p1["w2"].shape[0]
    assert p1["w1"].shape[0] == D and p2["w1"].shape[0] == D

    # ---- Head fusion along N: stacked / block-structured weight matrices ----
    w1 = jnp.concatenate([p1["w1"], p2["w1"]], axis=1).astype(compute_dtype)   # (D, 2H)
    b1 = jnp.concatenate([p1["b1"], p2["b1"]], axis=1).astype(jnp.float32)     # (1, 2H)

    z_hh = jnp.zeros((H, H), jnp.float32)
    w2 = jnp.concatenate([
        jnp.concatenate([p1["w2"], z_hh], axis=1),
        jnp.concatenate([z_hh, p2["w2"]], axis=1),
    ], axis=0).astype(compute_dtype)                                           # (2H, 2H)
    b2 = jnp.concatenate([p1["b2"], p2["b2"]], axis=1).astype(jnp.float32)     # (1, 2H)

    z_h1 = jnp.zeros((H, 1), jnp.float32)
    w3 = jnp.concatenate([
        jnp.concatenate([p1["w3"].reshape(H, 1), z_h1], axis=1),
        jnp.concatenate([z_h1, p2["w3"].reshape(H, 1)], axis=1),
    ], axis=0).astype(compute_dtype)                                           # (2H, 2)
    b3 = jnp.concatenate([p1["b3"].reshape(1, 1),
                          p2["b3"].reshape(1, 1)], axis=1).astype(jnp.float32)  # (1, 2)

    # ---- Batch tiling ----
    # Sublane multiple depends on the streamed dtype (bf16 needs 16, f32 needs 8).
    sub = {4: 8, 2: 16, 1: 32}[jnp.dtype(compute_dtype).itemsize]
    # Cap bm so that whenever the batch allows it we get >= 2 grid steps
    # (keeps v7x's second TensorCore busy for small RL batches).
    bm_cap = _round_up(pl.cdiv(B, 2), sub)
    bm = max(sub, min(_round_up(block_m, sub), bm_cap))
    grid = (pl.cdiv(B, bm),)

    out_cols = 2 if both else 1
    tanh_scale = (1.0 / (1.0 - gamma)) if use_tanh else None
    kernel = functools.partial(_cond_double_q_kernel,
                               tanh_scale=tanh_scale, both=both)

    def const_spec(a):
        # Whole array, constant index map -> stays VMEM-resident across steps.
        return pl.BlockSpec(a.shape, lambda i: (0, 0))

    args = [x, w1, b1, w2, b2, w3, b3]
    in_specs = [pl.BlockSpec((bm, D), lambda i: (i, 0))] + [const_spec(a) for a in args[1:]]

    out = pl.pallas_call(
        kernel,
        grid=grid,
        out_shape=jax.ShapeDtypeStruct((B, out_cols), jnp.float32),
        in_specs=in_specs,
        out_specs=pl.BlockSpec((bm, out_cols), lambda i: (i, 0)),
        compiler_params=pltpu.CompilerParams(
            dimension_semantics=("parallel",)),   # megacore sharding on v7x
    )(*args)

    if both:
        return out[:, 0:1], out[:, 1:2]
    return out


# --------------------------- Parameter init -----------------------------------
def init_params(key, obs_dim, action_dim, cond_dim, hidden_dim):
    """Orthogonal weights (as in orthogonal_init_), zero biases, for both heads.

    Weights are stored transposed ([in, out]) so the kernel computes x @ W.
    """
    if cond_dim > 0:
        in_dim = (obs_dim + cond_dim) + (action_dim + cond_dim)
    else:
        in_dim = obs_dim + action_dim
    ortho = jax.nn.initializers.orthogonal()
    keys = jax.random.split(key, 6)

    def head(k1, k2, k3):
        return {
            "w1": ortho(k1, (in_dim, hidden_dim), jnp.float32),
            "b1": jnp.zeros((1, hidden_dim), jnp.float32),
            "w2": ortho(k2, (hidden_dim, hidden_dim), jnp.float32),
            "b2": jnp.zeros((1, hidden_dim), jnp.float32),
            "w3": ortho(k3, (hidden_dim, 1), jnp.float32),
            "b3": jnp.zeros((1, 1), jnp.float32),
        }

    return {"q1": head(*keys[:3]), "q2": head(*keys[3:])}


# --------------------------- Pure-JAX reference --------------------------------
def reference_forward(obs, action, cond, params, *, use_tanh, gamma, both=False,
                      compute_dtype=jnp.float32):
    """Faithful PyTorch-semantics reference; compute_dtype mirrors the kernel's
    operand dtype (accumulation / bias / relu / tanh stay in f32)."""
    if cond is not None and cond.shape[-1] > 0:
        obs = jnp.concatenate([obs, cond], axis=-1)
        action = jnp.concatenate([action, cond], axis=-1)
    x = jnp.concatenate([obs, action], axis=-1).astype(compute_dtype)

    def mlp(p):
        h = jnp.dot(x, p["w1"].astype(compute_dtype),
                    preferred_element_type=jnp.float32) + p["b1"]
        h = jax.nn.relu(h).astype(compute_dtype)
        h = jnp.dot(h, p["w2"].astype(compute_dtype),
                    preferred_element_type=jnp.float32) + p["b2"]
        h = jax.nn.relu(h).astype(compute_dtype)
        return jnp.dot(h, p["w3"].astype(compute_dtype),
                       preferred_element_type=jnp.float32) + p["b3"]

    q1, q2 = mlp(params["q1"]), mlp(params["q2"])
    if use_tanh:
        s = 1.0 / (1.0 - gamma)
        q1, q2 = jnp.tanh(q1) * s, jnp.tanh(q2) * s
    return (q1, q2) if both else jnp.minimum(q1, q2)


# TODO(synk): grad_pen (autograd-based gradient penalty) is a training-time
# backward-pass construct and is not translated to a Pallas forward kernel.

if __name__ == "__main__":
    B, OBS_DIM, ACT_DIM, COND_DIM, HIDDEN = 8, 17, 6, 5, 32   # hidden_depth = 2
    USE_TANH, GAMMA = True, 0.99

    key = jax.random.PRNGKey(0)
    k_obs, k_act, k_cond, k_p, k_obs2, k_act2, k_cond2 = jax.random.split(key, 7)
    obs = jax.random.normal(k_obs, (B, OBS_DIM), jnp.float32)
    action = jax.random.normal(k_act, (B, ACT_DIM), jnp.float32)
    cond = jax.random.normal(k_cond, (B, COND_DIM), jnp.float32)

    params = init_params(k_p, OBS_DIM, ACT_DIM, COND_DIM, HIDDEN)

    # --- default bf16 MXU path: min(q1, q2) ---
    q_min = cond_double_q_forward(obs, action, cond, params,
                                  use_tanh=USE_TANH, gamma=GAMMA)
    q_min = jax.block_until_ready(q_min)
    q_min_ref = reference_forward(obs, action, cond, params,
                                  use_tanh=USE_TANH, gamma=GAMMA,
                                  compute_dtype=jnp.bfloat16)
    assert q_min.shape == (B, 1)
    assert jnp.allclose(q_min, q_min_ref, atol=2e-3, rtol=2e-3), (q_min, q_min_ref)

    # --- both=True path (bf16) ---
    q1, q2 = cond_double_q_forward(obs, action, cond, params,
                                   use_tanh=USE_TANH, gamma=GAMMA, both=True)
    jax.block_until_ready((q1, q2))
    q1_ref, q2_ref = reference_forward(obs, action, cond, params,
                                       use_tanh=USE_TANH, gamma=GAMMA, both=True,
                                       compute_dtype=jnp.bfloat16)
    assert jnp.allclose(q1, q1_ref, atol=2e-3, rtol=2e-3)
    assert jnp.allclose(q2, q2_ref, atol=2e-3, rtol=2e-3)

    # --- exact f32 path vs. f32 reference ---
    q_f32 = cond_double_q_forward(obs, action, cond, params,
                                  use_tanh=USE_TANH, gamma=GAMMA,
                                  compute_dtype=jnp.float32)
    q_f32 = jax.block_until_ready(q_f32)
    q_f32_ref = reference_forward(obs, action, cond, params,
                                  use_tanh=USE_TANH, gamma=GAMMA,
                                  compute_dtype=jnp.float32)
    assert jnp.allclose(q_f32, q_f32_ref, atol=1e-3, rtol=1e-3)

    # --- cond_dim == 0 path (v_cond = False), no tanh ---
    params0 = init_params(k_p, OBS_DIM, ACT_DIM, 0, HIDDEN)
    q0 = cond_double_q_forward(obs, action, None, params0,
                               use_tanh=False, gamma=GAMMA)
    q0 = jax.block_until_ready(q0)
    q0_ref = reference_forward(obs, action, None, params0,
                               use_tanh=False, gamma=GAMMA,
                               compute_dtype=jnp.bfloat16)
    assert jnp.allclose(q0, q0_ref, atol=2e-3, rtol=2e-3)

    # --- ragged batch (B not a multiple of the tile, >=2 grid steps) ---
    B2 = 50
    obs2 = jax.random.normal(k_obs2, (B2, OBS_DIM), jnp.float32)
    action2 = jax.random.normal(k_act2, (B2, ACT_DIM), jnp.float32)
    cond2 = jax.random.normal(k_cond2, (B2, COND_DIM), jnp.float32)
    qr = cond_double_q_forward(obs2, action2, cond2, params,
                               use_tanh=USE_TANH, gamma=GAMMA)
    qr = jax.block_until_ready(qr)
    qr_ref = reference_forward(obs2, action2, cond2, params,
                               use_tanh=USE_TANH, gamma=GAMMA,
                               compute_dtype=jnp.bfloat16)
    assert qr.shape == (B2, 1)
    assert jnp.allclose(qr, qr_ref, atol=2e-3, rtol=2e-3)

    print("KERNEL_OK")
</pallas_src>

<mosaic_0001>
module attributes {stable_mosaic.version = 11 : i64} {
  func.func @_cond_double_q_kernel(%arg0: i32, %arg1: memref<16x33xbf16, #tpu.memory_space<vmem>>, %arg2: memref<33x64xbf16, #tpu.memory_space<vmem>>, %arg3: memref<1x64xf32, #tpu.memory_space<vmem>>, %arg4: memref<64x64xbf16, #tpu.memory_space<vmem>>, %arg5: memref<1x64xf32, #tpu.memory_space<vmem>>, %arg6: memref<64x2xbf16, #tpu.memory_space<vmem>>, %arg7: memref<1x2xf32, #tpu.memory_space<vmem>>, %arg8: memref<16x1xf32, #tpu.memory_space<vmem>>) attributes {dimension_semantics = [#tpu.dimension_semantics<parallel>], iteration_bounds = array<i64: 1>, scalar_prefetch = 0 : i64, scratch_operands = 0 : i64, tpu.core_type = #tpu.core_type<tc>, window_params = [{transform_indices = @transform_0, window_bounds = array<i64: 16, 33>}, {pipeline_mode = #tpu.pipeline_mode<synchronous>, transform_indices = @transform_1, window_bounds = array<i64: 33, 64>}, {pipeline_mode = #tpu.pipeline_mode<synchronous>, transform_indices = @transform_2, window_bounds = array<i64: 1, 64>}, {pipeline_mode = #tpu.pipeline_mode<synchronous>, transform_indices = @transform_3, window_bounds = array<i64: 64, 64>}, {pipeline_mode = #tpu.pipeline_mode<synchronous>, transform_indices = @transform_4, window_bounds = array<i64: 1, 64>}, {pipeline_mode = #tpu.pipeline_mode<synchronous>, transform_indices = @transform_5, window_bounds = array<i64: 64, 2>}, {pipeline_mode = #tpu.pipeline_mode<synchronous>, transform_indices = @transform_6, window_bounds = array<i64: 1, 2>}, {transform_indices = @transform_7, window_bounds = array<i64: 16, 1>}]} {
    %c0 = arith.constant 0 : index
    %c0_0 = arith.constant 0 : index
    %0 = vector.load %arg1[%c0, %c0_0] : memref<16x33xbf16, #tpu.memory_space<vmem>>, vector<16x33xbf16>
    %c0_1 = arith.constant 0 : index
    %c0_2 = arith.constant 0 : index
    %1 = vector.load %arg2[%c0_1, %c0_2] : memref<33x64xbf16, #tpu.memory_space<vmem>>, vector<33x64xbf16>
    %cst = arith.constant dense<0.000000e+00> : vector<16x64xf32>
    %2 = tpu.matmul %0, %1, %cst {dimension_numbers = #tpu.dot_dimension_numbers<[1], [0], [0], [1], [0, 0, 1, 1], [], []>} : vector<16x33xbf16>, vector<33x64xbf16>, vector<16x64xf32> -> vector<16x64xf32>
    %c0_3 = arith.constant 0 : index
    %c0_4 = arith.constant 0 : index
    %3 = vector.load %arg3[%c0_3, %c0_4] : memref<1x64xf32, #tpu.memory_space<vmem>>, vector<1x64xf32>
    %4 = vector.broadcast %3 : vector<1x64xf32> to vector<16x64xf32>
    %5 = arith.addf %2, %4 : vector<16x64xf32>
    %cst_5 = arith.constant 0.000000e+00 : f32
    %6 = vector.broadcast %cst_5 : f32 to vector<16x64xf32>
    %7 = arith.maximumf %5, %6 : vector<16x64xf32>
    %8 = arith.truncf %7 : vector<16x64xf32> to vector<16x64xbf16>
    %c0_6 = arith.constant 0 : index
    %c0_7 = arith.constant 0 : index
    %9 = vector.load %arg4[%c0_6, %c0_7] : memref<64x64xbf16, #tpu.memory_space<vmem>>, vector<64x64xbf16>
    %cst_8 = arith.constant dense<0.000000e+00> : vector<16x64xf32>
    %10 = tpu.matmul %8, %9, %cst_8 {dimension_numbers = #tpu.dot_dimension_numbers<[1], [0], [0], [1], [0, 0, 1, 1], [], []>} : vector<16x64xbf16>, vector<64x64xbf16>, vector<16x64xf32> -> vector<16x64xf32>
    %c0_9 = arith.constant 0 : index
    %c0_10 = arith.constant 0 : index
    %11 = vector.load %arg5[%c0_9, %c0_10] : memref<1x64xf32, #tpu.memory_space<vmem>>, vector<1x64xf32>
    %12 = vector.broadcast %11 : vector<1x64xf32> to vector<16x64xf32>
    %13 = arith.addf %10, %12 : vector<16x64xf32>
    %cst_11 = arith.constant 0.000000e+00 : f32
    %14 = vector.broadcast %cst_11 : f32 to vector<16x64xf32>
    %15 = arith.maximumf %13, %14 : vector<16x64xf32>
    %16 = arith.truncf %15 : vector<16x64xf32> to vector<16x64xbf16>
    %c0_12 = arith.constant 0 : index
    %c0_13 = arith.constant 0 : index
    %17 = vector.load %arg6[%c0_12, %c0_13] : memref<64x2xbf16, #tpu.memory_space<vmem>>, vector<64x2xbf16>
    %cst_14 = arith.constant dense<0.000000e+00> : vector<16x2xf32>
    %18 = tpu.matmul %16, %17, %cst_14 {dimension_numbers = #tpu.dot_dimension_numbers<[1], [0], [0], [1], [0, 0, 1, 1], [], []>} : vector<16x64xbf16>, vector<64x2xbf16>, vector<16x2xf32> -> vector<16x2xf32>
    %c0_15 = arith.constant 0 : index
    %c0_16 = arith.constant 0 : index
    %19 = vector.load %arg7[%c0_15, %c0_16] : memref<1x2xf32, #tpu.memory_space<vmem>>, vector<1x2xf32>
    %20 = vector.broadcast %19 : vector<1x2xf32> to vector<16x2xf32>
    %21 = arith.addf %18, %20 : vector<16x2xf32>
    %22 = math.tanh %21 : vector<16x2xf32>
    %cst_17 = arith.constant 1.000000e+02 : f32
    %23 = vector.broadcast %cst_17 : f32 to vector<16x2xf32>
    %24 = arith.mulf %22, %23 : vector<16x2xf32>
    %25 = vector.extract_strided_slice %24 {offsets = [0, 0], sizes = [16, 1], strides = [1, 1]} : vector<16x2xf32> to vector<16x1xf32>
    %26 = vector.extract_strided_slice %24 {offsets = [0, 1], sizes = [16, 1], strides = [1, 1]} : vector<16x2xf32> to vector<16x1xf32>
    %27 = arith.minimumf %25, %26 : vector<16x1xf32>
    %c0_18 = arith.constant 0 : index
    %c0_19 = arith.constant 0 : index
    %28 = vector.load %arg8[%c0_18, %c0_19] : memref<16x1xf32, #tpu.memory_space<vmem>>, vector<16x1xf32>
    tpu.vector_store %arg8[%c0_18, %c0_19], %27 {strides = array<i32>} : memref<16x1xf32, #tpu.memory_space<vmem>>, vector<16x1xf32>,
    return
  }
  func.func @transform_0(%arg0: i32) -> (i32, i32) {
    %c0_i32 = arith.constant 0 : i32
    %c0_i32_0 = arith.constant 0 : i32
    return %arg0, %c0_i32 : i32, i32
  }
  func.func @transform_1(%arg0: i32) -> (i32, i32) {
    %c0_i32 = arith.constant 0 : i32
    %c0_i32_0 = arith.constant 0 : i32
    %c0_i32_1 = arith.constant 0 : i32
    return %c0_i32, %c0_i32_0 : i32, i32
  }
  func.func @transform_2(%arg0: i32) -> (i32, i32) {
    %c0_i32 = arith.constant 0 : i32
    %c0_i32_0 = arith.constant 0 : i32
    %c0_i32_1 = arith.constant 0 : i32
    return %c0_i32, %c0_i32_0 : i32, i32
  }
  func.func @transform_3(%arg0: i32) -> (i32, i32) {
    %c0_i32 = arith.constant 0 : i32
    %c0_i32_0 = arith.constant 0 : i32
    %c0_i32_1 = arith.constant 0 : i32
    return %c0_i32, %c0_i32_0 : i32, i32
  }
  func.func @transform_4(%arg0: i32) -> (i32, i32) {
    %c0_i32 = arith.constant 0 : i32
    %c0_i32_0 = arith.constant 0 : i32
    %c0_i32_1 = arith.constant 0 : i32
    return %c0_i32, %c0_i32_0 : i32, i32
  }
  func.func @transform_5(%arg0: i32) -> (i32, i32) {
    %c0_i32 = arith.constant 0 : i32
    %c0_i32_0 = arith.constant 0 : i32
    %c0_i32_1 = arith.constant 0 : i32
    return %c0_i32, %c0_i32_0 : i32, i32
  }
  func.func @transform_6(%arg0: i32) -> (i32, i32) {
    %c0_i32 = arith.constant 0 : i32
    %c0_i32_0 = arith.constant 0 : i32
    %c0_i32_1 = arith.constant 0 : i32
    return %c0_i32, %c0_i32_0 : i32, i32
  }
  func.func @transform_7(%arg0: i32) -> (i32, i32) {
    %c0_i32 = arith.constant 0 : i32
    %c0_i32_0 = arith.constant 0 : i32
    return %arg0, %c0_i32 : i32, i32
  }
}

</mosaic_0001>

<bundles_post_ra>
// kernel: tpu_custom_call.1
= control target key start
LH: loop header
LB: loop body
LE: loop exit
PB: predicated region body
PF: predicated region fallthrough
CT: control target
= control target key end

     0   :  { %12 = vsyncpa [#allocation3], 0  ;;  %s469_s24 = smov [#allocation2]   ;;  %s563_s0 = inlined_call_operand.vmem [shape: bf16[8,33], index: 0, kind: input, shape index: {}]   ;;  %s564_s1 = inlined_call_operand.hbm [shape: bf16[33,64], index: 1, kind: input, shape index: {}]   ;;  %s565_s2 = inlined_call_operand.vmem [shape: f32[1,64], index: 2, kind: input, shape index: {}]   ;;  %s566_s3 = inlined_call_operand.vmem [shape: bf16[64,64], index: 3, kind: input, shape index: {}]   ;;  %s567_s4 = inlined_call_operand.vmem [shape: f32[1,64], index: 4, kind: input, shape index: {}]   ;;  %s568_s5 = inlined_call_operand.vmem [shape: bf16[64,2], index: 5, kind: input, shape index: {}]   ;;  %s569_s6 = inlined_call_operand.vmem [shape: f32[1,2], index: 6, kind: input, shape index: {}]   ;;  %s570_s7 = inlined_call_operand.vmem [shape: f32[8,1], index: 7, kind: output, shape index: {}]  }
   0x1   :  { %s20_s25 = sshll.u32 %s469_s24, 4  ;;  %s21_s25 = int_to_ptr.vmem [resolvable:$true] %s20_s25 }
   0x2   :  { %s455_s26 = scalar_lea.vmem %s21_s25, 320  ;;  %p460_p1 = scmp.lt.s32.totalorder %s21_s25, %s21_s25 }
   0x3   :  { %p456_p0 = scmp.ne.s32.totalorder %s21_s25, %s455_s26  ;;  %p461_p2 = scmp.lt.s32.totalorder %s455_s26, %s455_s26 }
   0x5   :  { %p462_p3 = por %p461_p2, %p460_p1 }
   0x7   :  { %p463_p4 = pnand %p462_p3, %p456_p0 }
   0x9   :  { %466 = shalt.err (!%p463_p4)
}
   0xa   :  { %s470_s27 = smov 64   ;;  %s471_s28 = smov 4  }
   0xb   :  { %26 = dma.hbm_to_vmem [thread:$0]  %s564_s1, 320, %s21_s25, [#allocation3], %s470_s27, %s470_s27, %s471_s28  }
   0xc   :  { %467 = dma.done.wait [#allocation3], 320  }
   0xd   :  { %468 = vsyncadd [#allocation3], 4294966976  ;;  %v472_v0 = vmov 0.0   ;;  %vm473_vm0 = vmmov 0   ;;  %vm79_vm1 = vcmask 1040384   ;;  %v474_v1 = vmov 0  }
   0xe   :  { %390 = vmatprep.subr.bf16.mxu0 %v472_v0  ;;  %396 = vmatprep.mubr.msk.bf16.mxu0 %vm473_vm0, %v472_v0  ;;  %v81_v2 = vsel %vm79_vm1, 65535, %v474_v1  ;;  %v431_v3 = vld [vmem:[#allocation2 + $0x10] ss:$0 sps:$4 sm:$0x11]   ;;  %v432_v5 = vld [vmem:[#allocation2 + $0x8] sm:$0xff]   ;;  %v435_v6 = vld [vmem:[%s566_s3 + $0x18] sm:$0xff]  }
   0xf   :  { %400 = vmatprep.subr.bf16.mxu1 %v472_v0  ;;  %408 = vmatprep.mubr.msk.bf16.mxu1 %vm473_vm0, %v472_v0  ;;  %v83_v4 = vand.u32 %v431_v3, %v81_v2  ;;  %v433_v7 = vld [vmem:[#allocation2] sm:$0xff]   ;;  %vm75_vm2 = vcmask 269312   ;;  %v436_v9 = vld [vmem:[%s566_s3 + $0x10] sm:$0xff]   ;;  %v437_v10 = vld [vmem:[%s566_s3 + $0x8] sm:$0xff]   ;;  %vm168_vm3 = vcmask 523264   ;;  %vm313_vm4 = vcmask 7168  }
  0x10   :  { %401 = vmatpush3.bf16.msra.mxu1 %v435_v6  ;;  %v434_v8 = vld [vmem:[%s563_s0] sm:$0xff]   ;;  %v439_v12 = vld [vmem:[%s568_s5 + $0x18] sm:$0xff]   ;;  %v440_v23 = vld [vmem:[%s568_s5 + $0x10] sm:$0xff]  }
  0x11   :  { %391 = vmatpush3.bf16.msra.mxu0 %v83_v4  ;;  %402 = vmatprep.subr.bf16.mxu1 %v472_v0  ;;  %v438_v11 = vld [vmem:[%s566_s3] sm:$0xff]   ;;  %v441_v24 = vld [vmem:[%s568_s5 + $0x8] sm:$0xff]  }
  0x12   :  { %392 = vmatprep.subr.bf16.mxu0 %v472_v0  ;;  %v358_v13 = vld [vmem:[%s565_s2] ss:$0 sm:$0xff] }
  0x13   :  { %v442_v25 = vld [vmem:[%s568_s5] sm:$0xff]  }
  0x14   :  { %403 = vmatpush3.bf16.msra.mxu1 %v436_v9  ;;  %v364_v26 = vld [vmem:[%s567_s4] ss:$0 sm:$0xff]  ;;  %s475_s4 = smov 127  }
  0x15   :  { %393 = vmatpush3.bf16.msra.mxu0 %v432_v5  ;;  %404 = vmatprep.subr.bf16.mxu1 %v472_v0  ;;  %v370_v36 = vld [vmem:[%s569_s6] ss:$0 sm:$0xff] }
  0x16   :  { %394 = vmatprep.subr.bf16.mxu0 %v472_v0 }
  0x18   :  { %405 = vmatpush3.bf16.msra.mxu1 %v437_v10 }
  0x19   :  { %395 = vmatpush3.bf16.msra.mxu0 %v433_v7  ;;  %406 = vmatprep.subr.bf16.mxu1 %v472_v0 }
  0x1a   :  { %412 = vmatprep.subr.bf16.mxu0 %v472_v0 }
  0x1c   :  { %397 = vmatmul.mubr.msk.bf16.vlgmr.msra.gmra.mxu0 %vm75_vm2, %v434_v8  ;;  %407 = vmatpush3.bf16.msra.mxu1 %v438_v11 }
  0x1d   :  { %420 = vmatprep.mubr.msk.bf16.mxu0 %vm473_vm0, %v472_v0  ;;  %413 = vmatpush3.bf16.msra.mxu0 %v439_v12 }
  0x1e   :  { %414 = vmatprep.subr.bf16.mxu0 %v472_v0 }
  0x21   :  { %415 = vmatpush3.bf16.msra.mxu0 %v440_v23 }
  0x22   :  { %416 = vmatprep.subr.bf16.mxu0 %v472_v0 }
  0x25   :  { %417 = vmatpush3.bf16.msra.mxu0 %v441_v24 }
  0x26   :  { %418 = vmatprep.subr.bf16.mxu0 %v472_v0 }
  0x29   :  { %419 = vmatpush3.bf16.msra.mxu0 %v442_v25 }
  0xdc   :  { %v119_v14 = vpop.f32.mrf.mxu0 }
  0xdd   :  { %v120_v16 = vadd.f32 %v358_v13, %v119_v14 }
  0xde   :  { %v398_v15 = vpop.f32.mrf.mxu0 }
  0xdf   :  { %v126_v20 = vmax.f32 %v120_v16, 0.0 }
  0xe0   :  { %v122_v17 = vpop.f32.mrf.mxu0 }
  0xe1   :  { %v123_v18 = vadd.f32 %v358_v13, %v122_v17 }
  0xe2   :  { %v399_v19 = vpop.f32.mrf.mxu0 }
  0xe3   :  { %v127_v21 = vmax.f32 %v123_v18, 0.0 }
  0xe5   :  { %v128_v22 = vpack.c.bf16 %v127_v21, %v126_v20 }
  0xe7   :  { %409 = vmatmul.mubr.msk.bf16.vlgmr.msra.gmra.mxu1 %vm168_vm3, %v128_v22 }
 0x1a7   :  { %v206_v27 = vpop.f32.mrf.mxu1 }
 0x1a8   :  { %v207_v29 = vadd.f32 %v364_v26, %v206_v27 }
 0x1a9   :  { %v410_v28 = vpop.f32.mrf.mxu1 }
 0x1aa   :  { %v213_v33 = vmax.f32 %v207_v29, 0.0 }
 0x1ab   :  { %v209_v30 = vpop.f32.mrf.mxu1 }
 0x1ac   :  { %v210_v31 = vadd.f32 %v364_v26, %v209_v30 }
 0x1ad   :  { %v411_v32 = vpop.f32.mrf.mxu1 }
 0x1ae   :  { %v214_v34 = vmax.f32 %v210_v31, 0.0 }
 0x1b0   :  { %v215_v35 = vpack.c.bf16 %v214_v34, %v213_v33 }
 0x1b2   :  { %421 = vmatmul.mubr.msk.bf16.vlgmr.msra.gmra.mxu0 %vm168_vm3, %v215_v35 }
 0x272   :  { %v292_v37 = vpop.f32.mrf.mxu0 }
 0x273   :  { %v293_v38 = vadd.f32 %v370_v36, %v292_v37 }
 0x274   :  { %v422_v39 = vpop.f32.mrf.mxu0 }
 0x275   :  { %443 = vtanh.f32 %v293_v38 }
 0x276   :  { %v295_v40 = vpop.f32.mrf.mxu0 }
 0x277   :  { %v296_v41 = vadd.f32 %v370_v36, %v295_v40 }
 0x278   :  { %v423_v42 = vpop.f32.mrf.mxu0 }
 0x279   :  { %445 = vtanh.f32 %v296_v41 }
 0x282   :  { %v444_v43 = vpop.eup %443 }
 0x283   :  { %v301_v44 = vmul.f32 100.0, %v444_v43 }
 0x285   :  { %305 = vrot.lane.b32.xlu0 %v301_v44, %s475_s4 }
 0x286   :  { %v446_v45 = vpop.eup %445 }
 0x287   :  { %v302_v46 = vmul.f32 100.0, %v446_v45 }
 0x289   :  { %307 = vrot.lane.b32.xlu0 %v302_v46, %s475_s4 }
 0x2f7   :  { %v306_v47 = vpop.permute.xlu0 %305 }
 0x2f8   :  { %v311_v48 = vmin.f32 %v301_v44, %v306_v47 }
 0x2fa   :  { %314 = vst.msk [vmem:[#allocation4] sm:$0xff] %vm313_vm4, %v311_v48 }
 0x2fb   :  { %v308_v49 = vpop.permute.xlu0 %307 }
 0x301   :  { %v346_v50 = vld [vmem:[#allocation4] sm:$0xff] }
 0x302   :  { %347 = vst [vmem:[%s570_s7] sm:$0xff] %v346_v50 }
 0x303   :  { %353 = vsyncpa [#allocation3], 1 }

</bundles_post_ra>
